<compile_context>
chip_gen: v6e
topology: v6e:2x2x1
jax: 0.10.0
libtpu: 0.0.40
codegen_flags: <defaults>
</compile_context>

<pallas_src>
import jax
import jax.numpy as jnp
from jax.experimental import pallas as pl
from jax.experimental.pallas import tpu as pltpu


_LANE_W = 512        # lane-dense last dim (multiple of 128 -> unmasked vst)
_MAX_TILE_R = 1024   # 1024 x 512 f32 = 2 MiB per buffer per tile

# Native sublane count per element size (f32 vreg is [8,128], bf16 [16,128], int8 [32,128]).
_SUBLANE_BY_ITEMSIZE = {4: 8, 2: 16, 1: 32}


def _softplus_double_kernel(x_ref, o_ref):
    x = x_ref[...]
    y = x + x
    thr = jnp.asarray(20.0, dtype=y.dtype)
    # Clamp inside exp so the untaken branch of the `where` (and any ragged
    # edge-block padding) can't overflow.
    sp = jnp.log1p(jnp.exp(jnp.minimum(y, thr)))
    o_ref[...] = jnp.where(y > thr, y, sp).astype(o_ref.dtype)


def _softplus_double_jnp(x: jax.Array) -> jax.Array:
    y = x + x
    return jnp.where(
        y > 20.0, y, jnp.log1p(jnp.exp(jnp.minimum(y, 20.0)))
    ).astype(x.dtype)


def _round_up(a: int, b: int) -> int:
    return ((a + b - 1) // b) * b


def softplus_double(x: jax.Array) -> jax.Array:
    """Computes softplus(x + x) with a tiled, lane-dense Pallas TPU kernel."""
    orig_shape = x.shape
    total = int(x.size)
    if total == 0:
        return x

    x_flat = x.reshape(total)          # contiguous reshape: free (bitcast)
    rows = total // _LANE_W
    rem = total - rows * _LANE_W

    if rows == 0:
        # Sub-512-element input: per-call overhead dominates; plain jnp wins.
        return _softplus_double_jnp(x_flat).reshape(orig_shape)

    sublane = _SUBLANE_BY_ITEMSIZE.get(jnp.dtype(x.dtype).itemsize, 8)

    # Tile sizing: as big as possible (amortize per-step overhead), but split
    # into >= 2 blocks when there is enough work so v7x's two TensorCores are
    # both used. If rows < 2*sublane, the block equals the full first dim
    # (layout-legal without (8,128) divisibility).
    if rows >= 2 * sublane:
        tile_r = min(_MAX_TILE_R, _round_up(pl.cdiv(rows, 2), sublane))
    else:
        tile_r = rows
    grid = pl.cdiv(rows, tile_r)

    main = rows * _LANE_W
    main_flat = x_flat[:main] if rem else x_flat
    x2 = main_flat.reshape(rows, _LANE_W)

    itemsize = jnp.dtype(x.dtype).itemsize
    cost = pl.CostEstimate(
        flops=3 * main,
        transcendentals=2 * main,
        bytes_accessed=2 * main * itemsize,
    )

    out2 = pl.pallas_call(
        _softplus_double_kernel,
        out_shape=jax.ShapeDtypeStruct((rows, _LANE_W), x.dtype),
        grid_spec=pl.GridSpec(
            grid=(grid,),
            in_specs=[pl.BlockSpec((tile_r, _LANE_W), lambda i: (i, 0))],
            out_specs=pl.BlockSpec((tile_r, _LANE_W), lambda i: (i, 0)),
        ),
        compiler_params=pltpu.CompilerParams(
            dimension_semantics=("parallel",),
        ),
        cost_estimate=cost,
    )(x2)

    out_flat = out2.reshape(main)
    if rem:
        # <_LANE_W leftover elements: compute outside the kernel, no padding.
        tail_out = _softplus_double_jnp(x_flat[main:])
        out_flat = jnp.concatenate([out_flat, tail_out])
    return out_flat.reshape(orig_shape)


if __name__ == "__main__":
    key = jax.random.PRNGKey(0)
    # Small NCHW-style input consistent with the module's forward; scaled so
    # the y > 20 threshold branch is occasionally exercised.
    x = jax.random.normal(key, (2, 4, 16, 16), dtype=jnp.float32) * 12.0

    out = softplus_double(x)
    jax.block_until_ready(out)

    ref = _softplus_double_jnp(x)
    assert out.shape == x.shape and out.dtype == x.dtype
    assert jnp.allclose(out, ref, atol=1e-5, rtol=1e-5), "mismatch vs reference"

    print("KERNEL_OK")
</pallas_src>

<mosaic_0001>
module attributes {stable_mosaic.version = 11 : i64} {
  func.func @_softplus_double_kernel(%arg0: i32, %arg1: memref<4x512xf32, #tpu.memory_space<vmem>>, %arg2: memref<4x512xf32, #tpu.memory_space<vmem>>) attributes {dimension_semantics = [#tpu.dimension_semantics<parallel>], iteration_bounds = array<i64: 1>, scalar_prefetch = 0 : i64, scratch_operands = 0 : i64, tpu.core_type = #tpu.core_type<tc>, window_params = [{transform_indices = @transform_0, window_bounds = array<i64: 4, 512>}, {transform_indices = @transform_1, window_bounds = array<i64: 4, 512>}]} {
    %c0 = arith.constant 0 : index
    %c0_0 = arith.constant 0 : index
    %0 = vector.load %arg1[%c0, %c0_0] : memref<4x512xf32, #tpu.memory_space<vmem>>, vector<4x512xf32>
    %1 = arith.addf %0, %0 : vector<4x512xf32>
    %cst = arith.constant 2.000000e+01 : f32
    %2 = vector.broadcast %cst : f32 to vector<4x512xf32>
    %3 = arith.minimumf %1, %2 : vector<4x512xf32>
    %4 = math.exp %3 : vector<4x512xf32>
    %5 = math.log1p %4 : vector<4x512xf32>
    %cst_1 = arith.constant 2.000000e+01 : f32
    %6 = vector.broadcast %cst_1 : f32 to vector<4x512xf32>
    %7 = arith.cmpf ogt, %1, %6 : vector<4x512xf32>
    %8 = arith.select %7, %1, %5 : vector<4x512xi1>, vector<4x512xf32>
    %c0_2 = arith.constant 0 : index
    %c0_3 = arith.constant 0 : index
    %9 = vector.load %arg2[%c0_2, %c0_3] : memref<4x512xf32, #tpu.memory_space<vmem>>, vector<4x512xf32>
    tpu.vector_store %arg2[%c0_2, %c0_3], %8 {strides = array<i32>} : memref<4x512xf32, #tpu.memory_space<vmem>>, vector<4x512xf32>,
    return
  }
  func.func @transform_0(%arg0: i32) -> (i32, i32) {
    %c0_i32 = arith.constant 0 : i32
    %c0_i32_0 = arith.constant 0 : i32
    return %arg0, %c0_i32 : i32, i32
  }
  func.func @transform_1(%arg0: i32) -> (i32, i32) {
    %c0_i32 = arith.constant 0 : i32
    %c0_i32_0 = arith.constant 0 : i32
    return %arg0, %c0_i32 : i32, i32
  }
}

</mosaic_0001>

<bundles_post_ra>
// kernel: tpu_custom_call.1
= control target key start
LH: loop header
LB: loop body
LE: loop exit
PB: predicated region body
PF: predicated region fallthrough
CT: control target
= control target key end

     0   :  { %6 = vsyncpa [#allocation3], 0  ;;  %s142_s0 = inlined_call_operand.hbm [shape: f32[4,512], index: 0, kind: input, shape index: {}]   ;;  %s143_s1 = inlined_call_operand.hbm [shape: f32[4,512], index: 1, kind: output, shape index: {}]  }
   0x1   :  { %7 = vsyncpa [#allocation4], 0  ;;  %s124_s6 = smov [#allocation2]  }
   0x2   :  { %s14_s7 = sshll.u32 %s124_s6, 4  ;;  %s15_s7 = int_to_ptr.vmem [resolvable:$true] %s14_s7 }
   0x3   :  { %s88_s8 = scalar_lea.vmem %s15_s7, 256  ;;  %p93_p1 = scmp.lt.s32.totalorder %s15_s7, %s15_s7 }
   0x4   :  { %p89_p0 = scmp.ne.s32.totalorder %s15_s7, %s88_s8  ;;  %p94_p2 = scmp.lt.s32.totalorder %s88_s8, %s88_s8 }
   0x6   :  { %p95_p3 = por %p94_p2, %p93_p1 }
   0x8   :  { %p96_p4 = pnand %p95_p3, %p89_p0 }
   0xa   :  { %99 = shalt.err (!%p96_p4)
}
   0xb   :  { %17 = dma.hbm_to_vmem [thread:$0]  %s142_s0, 256, %s15_s7, [#allocation3]  }
   0xc   :  { %120 = dma.done.wait [#allocation3], 256  }
   0xd   :  { %121 = vsyncadd [#allocation3], 4294967040  ;;  %v21_v0 = vld [vmem:[#allocation2] sm:$0xff]  ;;  %v22_v1 = vld [vmem:[#allocation2 + $0x8] sm:$0xff]  ;;  %s125_s0 = smov [#allocation5]  }
   0xe   :  { %v23_v2 = vadd.f32 %v21_v0, %v21_v0  ;;  %v24_v3 = vadd.f32 %v22_v1, %v22_v1  ;;  %s61_s11 = sshll.u32 %s125_s0, 4  ;;  %s62_s11 = int_to_ptr.vmem [resolvable:$true] %s61_s11 }
   0xf   :  { %s100_s12 = scalar_lea.vmem %s62_s11, 256  ;;  %p105_p6 = scmp.lt.s32.totalorder %s62_s11, %s62_s11 }
  0x10   :  { %v25_v4 = vmin.f32 %v23_v2, 20.0  ;;  %v26_v5 = vmin.f32 %v24_v3, 20.0  ;;  %vm49_vm1 = vcmp.gt.f32.partialorder %v23_v2, 20.0  ;;  %vm50_vm3 = vcmp.gt.f32.partialorder %v24_v3, 20.0  ;;  %p101_p5 = scmp.ne.s32.totalorder %s62_s11, %s100_s12  ;;  %p106_p7 = scmp.lt.s32.totalorder %s100_s12, %s100_s12 }
  0x12   :  { %v27_v6 = vmul.f32 1.442695, %v25_v4  ;;  %v29_v7 = vmul.f32 1.442695, %v26_v5  ;;  %p107_p8 = por %p106_p7, %p105_p6 }
  0x14   :  { %72 = vpow2.f32 %v27_v6  ;;  %p108_p9 = pnand %p107_p8, %p101_p5 }
  0x15   :  { %74 = vpow2.f32 %v29_v7 }
  0x21   :  { %v73_v8 = vpop.eup %72 }
  0x22   :  { %v75_v9 = vpop.eup %74  ;;  %v31_v10 = vadd.f32 1.0, %v73_v8  ;;  %v34_v12 = vmul.f32 -0.5, %v73_v8  ;;  %v37_v15 = vand.u32 2147483647, %v73_v8 }
  0x23   :  { %v40_v11 = vadd.f32 1.0, %v75_v9  ;;  %v43_v13 = vmul.f32 -0.5, %v75_v9  ;;  %v46_v17 = vand.u32 2147483647, %v75_v9 }
  0x24   :  { %76 = vlog2.f32 %v31_v10  ;;  %v35_v14 = vadd.f32 1.0, %v34_v12  ;;  %vm38_vm0 = vcmp.lt.f32.partialorder %v37_v15, 0.0004427343 }
  0x25   :  { %78 = vlog2.f32 %v40_v11  ;;  %v44_v16 = vadd.f32 1.0, %v43_v13  ;;  %vm47_vm2 = vcmp.lt.f32.partialorder %v46_v17, 0.0004427343 }
  0x26   :  { %v36_v18 = vmul.f32 %v73_v8, %v35_v14 }
  0x27   :  { %v45_v20 = vmul.f32 %v75_v9, %v44_v16 }
  0x31   :  { %v77_v19 = vpop.eup %76 }
  0x32   :  { %v79_v21 = vpop.eup %78  ;;  %v33_v22 = vmul.f32 0.6931472, %v77_v19 }
  0x33   :  { %v42_v23 = vmul.f32 0.6931472, %v79_v21 }
  0x34   :  { %v39_v24 = vsel %vm38_vm0, %v36_v18, %v33_v22 }
  0x35   :  { %v51_v25 = vsel %vm49_vm1, %v23_v2, %v39_v24  ;;  %v48_v26 = vsel %vm47_vm2, %v45_v20, %v42_v23 }
  0x36   :  { %53 = vst [vmem:[#allocation5] sm:$0xff] %v51_v25  ;;  %v52_v27 = vsel %vm50_vm3, %v24_v3, %v48_v26 }
  0x37   :  { %54 = vst [vmem:[#allocation5 + $0x8] sm:$0xff] %v52_v27 }
  0x38   :  { %111 = shalt.err (!%p108_p9)
}
  0x39   :  { %64 = dma.vmem_to_hbm [thread:$0]  %s62_s11, 256, %s143_s1, [#allocation4]  }
  0x3a   :  { %122 = dma.done.wait [#allocation4], 256  }
  0x3b   :  { %123 = vsyncadd [#allocation4], 4294967040 }
  0x3c   :  { %68 = vsyncpa [#allocation3], 1 }
  0x3d   :  { %69 = vsyncpa [#allocation4], 1 }

</bundles_post_ra>
